<compile_context>
chip_gen: v7x
topology: tpu7x:2x2x1
jax: 0.10.0
libtpu: 0.0.40
codegen_flags: <defaults>
</compile_context>

<pallas_src>
import jax
import jax.numpy as jnp
from jax.experimental import pallas as pl
from jax.experimental.pallas import tpu as pltpu

EPS = 1e-5


def _conv_bn_kernel(x_ref, m_ref, shift_ref, o_ref):
    """ReLU -> 3x3 conv (3 banded matmuls) -> folded-BN shift add.

    x_ref     : (nb, H+2, W*C) bf16, height-zero-padded, lane-packed (w-major, c-minor)
    m_ref     : (3, W*C, W*C)  bf16 banded conv matrices (BN scale pre-folded), one per kh tap
    shift_ref : (1, W*C)       f32 folded BN shift
    o_ref     : (nb*H, W*C)    f32 output, lane-dense
    """
    nb, hp, wc = x_ref.shape
    h = hp - 2

    x = jnp.maximum(x_ref[...], 0)  # ReLU in bf16 (padding rows stay zero)

    # 3x3 conv as 3 MXU pushes, one per kh row-tap, contracting the packed
    # (kw, ci) lane axis (K = W*C) with an (nb*H)-row M axis.
    # TODO(synk): the kh=1,2 slices start at non-8-multiple sublane offsets; if Mosaic
    #             materializes retile copies here, move the shift to pltpu.roll (XLU).
    acc = jnp.dot(x[:, 0:h, :].reshape(nb * h, wc), m_ref[0],
                  preferred_element_type=jnp.float32)
    acc += jnp.dot(x[:, 1:h + 1, :].reshape(nb * h, wc), m_ref[1],
                   preferred_element_type=jnp.float32)
    acc += jnp.dot(x[:, 2:h + 2, :].reshape(nb * h, wc), m_ref[2],
                   preferred_element_type=jnp.float32)

    # Fused BatchNorm (inference): scale already folded into m; add shift only.
    o_ref[...] = (acc + shift_ref[...]).astype(o_ref.dtype)


def _resident_spec(block_shape, index_map):
    # Constant-index operands never re-DMA; single-buffer them so the pipeline does
    # not double their VMEM reservation (fall back gracefully on older JAX).
    try:
        return pl.BlockSpec(block_shape, index_map, pipeline_mode=pl.Buffered(1))
    except (TypeError, AttributeError):
        return pl.BlockSpec(block_shape, index_map)


def conv_block_nchw(x_nchw, w_oihw, gamma, beta, running_mean, running_var):
    """ReLU -> Conv2d(3x3, pad=1, stride=1, no bias) -> BatchNorm2d (eval)."""
    N, C, H, W = x_nchw.shape
    assert w_oihw.shape == (C, C, 3, 3)
    assert (W * C) % 128 == 0 and H % 8 == 0, "demo layout: lane-dense W*C, sublane-aligned H"
    Hp = H + 2
    WC = W * C
    out_dtype = jnp.float32

    # --- layout: NCHW -> height-zero-padded, lane-packed (N, H+2, W*C), bf16 ---
    x_nhwc = jnp.transpose(x_nchw, (0, 2, 3, 1)).astype(jnp.bfloat16)
    x_pad = jnp.pad(x_nhwc, ((0, 0), (1, 1), (0, 0), (0, 0)))
    x_packed = x_pad.reshape(N, Hp, WC)

    # --- fold BN scale into the conv weights; keep only the shift ---
    scale_c = (gamma.astype(jnp.float32) *
               jax.lax.rsqrt(running_var.astype(jnp.float32) + EPS))
    shift_c = beta.astype(jnp.float32) - running_mean.astype(jnp.float32) * scale_c
    shift_p = jnp.tile(shift_c, W).reshape(1, WC)

    # --- banded conv matrices, no width pad (K = W*C): ---
    #     M[kh, iw*C+ci, w*C+co] = w[co,ci,kh,kw] * scale[co]   with iw = w + kw - 1
    w_t = jnp.transpose(w_oihw, (2, 3, 1, 0)).astype(jnp.float32)      # (kh, kw, ci, co)
    w_fold = w_t * scale_c[None, None, None, :]
    m = jnp.stack([
        sum(jnp.kron(jnp.eye(W, W, 1 - kw, dtype=jnp.float32), w_fold[kh, kw])
            for kw in range(3))
        for kh in range(3)
    ]).astype(jnp.bfloat16)                                            # (3, WC, WC)

    # --- batch blocking: single step on v5e/v6e (one TensorCore); split only on
    #     v7x (megacore), and only while the tile fits a conservative VMEM budget. ---
    const_bytes = 3 * WC * WC * 2 + WC * 4                  # resident weights + shift
    def _tile_bytes(nb):                                    # double-buffered x + out blocks
        return 2 * (nb * Hp * WC * 2 + nb * H * WC * 4)

    try:
        kind = jax.devices()[0].device_kind.lower()
    except Exception:
        kind = ""
    min_steps = 2 if ("v7" in kind and N >= 2 and N % 2 == 0) else 1
    budget = 40 << 20                                        # safe across v5e/v6e/v7x

    nb, steps = 1, N
    for s in [d for d in range(1, N + 1) if N % d == 0]:
        if s < min_steps:
            continue
        cand = N // s
        if _tile_bytes(cand) + 2 * const_bytes <= budget:
            nb, steps = cand, s
            break

    vmem_need = _tile_bytes(nb) + 2 * const_bytes
    vmem_limit = int(min(48 << 20, max(vmem_need + (4 << 20), 16 << 20)))

    out_flat = pl.pallas_call(
        _conv_bn_kernel,
        out_shape=jax.ShapeDtypeStruct((N * H, WC), out_dtype),
        grid_spec=pltpu.PrefetchScalarGridSpec(
            num_scalar_prefetch=0,
            grid=(steps,),
            in_specs=[
                pl.BlockSpec((nb, Hp, WC), lambda n: (n, 0, 0)),
                _resident_spec((3, WC, WC), lambda n: (0, 0, 0)),   # weights resident
                _resident_spec((1, WC), lambda n: (0, 0)),          # shift resident
            ],
            out_specs=pl.BlockSpec((nb * H, WC), lambda n: (n, 0)),
        ),
        compiler_params=pltpu.CompilerParams(
            dimension_semantics=("parallel",),
            vmem_limit_bytes=vmem_limit),
    )(x_packed, m, shift_p)

    # lane-packed (N*H, W*C) -> NCHW
    return jnp.transpose(out_flat.reshape(N, H, W, C), (0, 3, 1, 2))


def _reference(x_nchw, w_oihw, gamma, beta, mean, var):
    """Pure-JAX reference (mirrors the kernel's bf16 operand rounding)."""
    scale = gamma / jnp.sqrt(var + EPS)
    shift = beta - mean * scale
    w_fold = (w_oihw.astype(jnp.float32) * scale[:, None, None, None]
              ).astype(jnp.bfloat16).astype(jnp.float32)
    xq = jnp.maximum(x_nchw, 0.0).astype(jnp.bfloat16).astype(jnp.float32)
    y = jax.lax.conv_general_dilated(
        xq, w_fold, window_strides=(1, 1), padding=((1, 1), (1, 1)),
        dimension_numbers=("NCHW", "OIHW", "NCHW"))
    return y + shift.reshape(1, -1, 1, 1)


if __name__ == "__main__":
    key = jax.random.PRNGKey(0)
    k_x, k_w, k_g, k_b, k_m, k_v = jax.random.split(key, 6)

    # batch=2, planes=8, spatial=16  ->  W*C = 128 (one full lane row per H row)
    N, C, H, W = 2, 8, 16, 16

    x = jax.random.normal(k_x, (N, C, H, W), dtype=jnp.float32)
    w = jax.random.normal(k_w, (C, C, 3, 3), dtype=jnp.float32) * 0.1
    gamma = jax.random.normal(k_g, (C,), dtype=jnp.float32) * 0.1 + 1.0
    beta = jax.random.normal(k_b, (C,), dtype=jnp.float32) * 0.1
    running_mean = jax.random.normal(k_m, (C,), dtype=jnp.float32) * 0.1
    running_var = jax.random.uniform(k_v, (C,), dtype=jnp.float32) + 0.5

    out = conv_block_nchw(x, w, gamma, beta, running_mean, running_var)
    out = jax.block_until_ready(out)

    ref = _reference(x, w, gamma, beta, running_mean, running_var)
    assert out.shape == (N, C, H, W)
    assert jnp.allclose(out, ref, atol=2e-3, rtol=2e-3), "mismatch vs reference"

    print("KERNEL_OK")
</pallas_src>

<mosaic_0001>
module attributes {stable_mosaic.version = 11 : i64} {
  func.func @_conv_bn_kernel(%arg0: i32, %arg1: memref<2x18x128xbf16, #tpu.memory_space<vmem>>, %arg2: memref<3x128x128xbf16, #tpu.memory_space<vmem>>, %arg3: memref<1x128xf32, #tpu.memory_space<vmem>>, %arg4: memref<32x128xf32, #tpu.memory_space<vmem>>) attributes {dimension_semantics = [#tpu.dimension_semantics<parallel>], iteration_bounds = array<i64: 1>, scalar_prefetch = 0 : i64, scratch_operands = 0 : i64, tpu.core_type = #tpu.core_type<tc>, window_params = [{transform_indices = @transform_0, window_bounds = array<i64: 2, 18, 128>}, {pipeline_mode = #tpu.pipeline_mode<synchronous>, transform_indices = @transform_1, window_bounds = array<i64: 3, 128, 128>}, {pipeline_mode = #tpu.pipeline_mode<synchronous>, transform_indices = @transform_2, window_bounds = array<i64: 1, 128>}, {transform_indices = @transform_3, window_bounds = array<i64: 32, 128>}]} {
    %c0 = arith.constant 0 : index
    %c0_0 = arith.constant 0 : index
    %c0_1 = arith.constant 0 : index
    %0 = vector.load %arg1[%c0, %c0_0, %c0_1] : memref<2x18x128xbf16, #tpu.memory_space<vmem>>, vector<2x18x128xbf16>
    %cst = arith.constant 0.000000e+00 : bf16
    %1 = vector.broadcast %cst : bf16 to vector<2x18x128xbf16>
    %2 = arith.maximumf %0, %1 : vector<2x18x128xbf16>
    %3 = vector.extract_strided_slice %2 {offsets = [0, 0, 0], sizes = [2, 16, 128], strides = [1, 1, 1]} : vector<2x18x128xbf16> to vector<2x16x128xbf16>
    %4 = vector.shape_cast %3 : vector<2x16x128xbf16> to vector<32x128xbf16>
    %c0_2 = arith.constant 0 : index
    %c0_3 = arith.constant 0 : index
    %c0_4 = arith.constant 0 : index
    %5 = vector.load %arg2[%c0_2, %c0_3, %c0_4] : memref<3x128x128xbf16, #tpu.memory_space<vmem>>, vector<1x128x128xbf16>
    %6 = vector.shape_cast %5 : vector<1x128x128xbf16> to vector<128x128xbf16>
    %cst_5 = arith.constant dense<0.000000e+00> : vector<32x128xf32>
    %7 = tpu.matmul %4, %6, %cst_5 {dimension_numbers = #tpu.dot_dimension_numbers<[1], [0], [0], [1], [0, 0, 1, 1], [], []>} : vector<32x128xbf16>, vector<128x128xbf16>, vector<32x128xf32> -> vector<32x128xf32>
    %8 = vector.extract_strided_slice %2 {offsets = [0, 1, 0], sizes = [2, 16, 128], strides = [1, 1, 1]} : vector<2x18x128xbf16> to vector<2x16x128xbf16>
    %9 = vector.shape_cast %8 : vector<2x16x128xbf16> to vector<32x128xbf16>
    %c1 = arith.constant 1 : index
    %c0_6 = arith.constant 0 : index
    %c0_7 = arith.constant 0 : index
    %10 = vector.load %arg2[%c1, %c0_6, %c0_7] : memref<3x128x128xbf16, #tpu.memory_space<vmem>>, vector<1x128x128xbf16>
    %11 = vector.shape_cast %10 : vector<1x128x128xbf16> to vector<128x128xbf16>
    %cst_8 = arith.constant dense<0.000000e+00> : vector<32x128xf32>
    %12 = tpu.matmul %9, %11, %cst_8 {dimension_numbers = #tpu.dot_dimension_numbers<[1], [0], [0], [1], [0, 0, 1, 1], [], []>} : vector<32x128xbf16>, vector<128x128xbf16>, vector<32x128xf32> -> vector<32x128xf32>
    %13 = arith.addf %7, %12 : vector<32x128xf32>
    %14 = vector.extract_strided_slice %2 {offsets = [0, 2, 0], sizes = [2, 16, 128], strides = [1, 1, 1]} : vector<2x18x128xbf16> to vector<2x16x128xbf16>
    %15 = vector.shape_cast %14 : vector<2x16x128xbf16> to vector<32x128xbf16>
    %c2 = arith.constant 2 : index
    %c0_9 = arith.constant 0 : index
    %c0_10 = arith.constant 0 : index
    %16 = vector.load %arg2[%c2, %c0_9, %c0_10] : memref<3x128x128xbf16, #tpu.memory_space<vmem>>, vector<1x128x128xbf16>
    %17 = vector.shape_cast %16 : vector<1x128x128xbf16> to vector<128x128xbf16>
    %cst_11 = arith.constant dense<0.000000e+00> : vector<32x128xf32>
    %18 = tpu.matmul %15, %17, %cst_11 {dimension_numbers = #tpu.dot_dimension_numbers<[1], [0], [0], [1], [0, 0, 1, 1], [], []>} : vector<32x128xbf16>, vector<128x128xbf16>, vector<32x128xf32> -> vector<32x128xf32>
    %19 = arith.addf %13, %18 : vector<32x128xf32>
    %c0_12 = arith.constant 0 : index
    %c0_13 = arith.constant 0 : index
    %20 = vector.load %arg3[%c0_12, %c0_13] : memref<1x128xf32, #tpu.memory_space<vmem>>, vector<1x128xf32>
    %21 = vector.broadcast %20 : vector<1x128xf32> to vector<32x128xf32>
    %22 = arith.addf %19, %21 : vector<32x128xf32>
    %c0_14 = arith.constant 0 : index
    %c0_15 = arith.constant 0 : index
    %23 = vector.load %arg4[%c0_14, %c0_15] : memref<32x128xf32, #tpu.memory_space<vmem>>, vector<32x128xf32>
    tpu.vector_store %arg4[%c0_14, %c0_15], %22 {strides = array<i32>} : memref<32x128xf32, #tpu.memory_space<vmem>>, vector<32x128xf32>,
    return
  }
  func.func @transform_0(%arg0: i32) -> (i32, i32, i32) {
    %c0_i32 = arith.constant 0 : i32
    %c0_i32_0 = arith.constant 0 : i32
    %c0_i32_1 = arith.constant 0 : i32
    return %arg0, %c0_i32, %c0_i32_0 : i32, i32, i32
  }
  func.func @transform_1(%arg0: i32) -> (i32, i32, i32) {
    %c0_i32 = arith.constant 0 : i32
    %c0_i32_0 = arith.constant 0 : i32
    %c0_i32_1 = arith.constant 0 : i32
    %c0_i32_2 = arith.constant 0 : i32
    return %c0_i32, %c0_i32_0, %c0_i32_1 : i32, i32, i32
  }
  func.func @transform_2(%arg0: i32) -> (i32, i32) {
    %c0_i32 = arith.constant 0 : i32
    %c0_i32_0 = arith.constant 0 : i32
    %c0_i32_1 = arith.constant 0 : i32
    return %c0_i32, %c0_i32_0 : i32, i32
  }
  func.func @transform_3(%arg0: i32) -> (i32, i32) {
    %c0_i32 = arith.constant 0 : i32
    %c0_i32_0 = arith.constant 0 : i32
    return %arg0, %c0_i32 : i32, i32
  }
}

</mosaic_0001>

<bundles_post_ra>
// kernel: tpu_custom_call.1
= control target key start
LH: loop header
LB: loop body
LE: loop exit
PB: predicated region body
PF: predicated region fallthrough
CT: control target
= control target key end

     0   :  { %8 = vsyncpa [#allocation3], 0  ;;  %s855_s0 = inlined_call_operand.vmem [shape: bf16[2,18,128], index: 0, kind: input, shape index: {}]   ;;  %s856_s1 = inlined_call_operand.hbm [shape: bf16[3,128,128], index: 1, kind: input, shape index: {}]   ;;  %s857_s2 = inlined_call_operand.vmem [shape: f32[1,128], index: 2, kind: input, shape index: {}]   ;;  %s858_s3 = inlined_call_operand.hbm [shape: f32[32,128], index: 3, kind: output, shape index: {}]  }
   0x1   :  { %9 = vsyncpa [#allocation4], 0  ;;  %s727_s12 = smov [#allocation2]   ;;  %s679_s16 = scalar_lea.hbm %s856_s1, 3072 }
   0x2   :  { %s17_s13 = sshll.u32 %s727_s12, 4  ;;  %p680_p0 = scmp.ne.s32.totalorder %s856_s1, %s679_s16  ;;  %s18_s13 = int_to_ptr.vmem [resolvable:$true] %s17_s13 }
   0x3   :  { %p683_p1 = scmp.lt.u32.totalorder %s679_s16, %s856_s1 }
   0x5   :  { %p685_p2 = pnand %p683_p1, %p680_p0 }
   0x7   :  { %688 = shalt.err (!%p685_p2)
}
   0x8   :  { %s689_s21 = scalar_lea.vmem %s18_s13, 3072  ;;  %p694_p4 = scmp.lt.s32.totalorder %s18_s13, %s18_s13 }
   0x9   :  { %p690_p3 = scmp.ne.s32.totalorder %s18_s13, %s689_s21  ;;  %p695_p5 = scmp.lt.s32.totalorder %s689_s21, %s689_s21 }
   0xb   :  { %p696_p6 = por %p695_p5, %p694_p4 }
   0xd   :  { %p697_p7 = pnand %p696_p6, %p690_p3 }
   0xf   :  { %700 = shalt.err (!%p697_p7)
}
  0x10   :  { %s728_s22 = smov 64   ;;  %s729_s23 = smov 4  }
  0x11   :  { %23 = dma.hbm_to_vmem [thread:$0]  %s856_s1, 3072, %s18_s13, [#allocation3], %s728_s22, %s728_s22, %s729_s23  }
  0x12   :  { %723 = dma.done.wait [#allocation3], 3072  }
  0x13   :  { %724 = vsyncadd [#allocation3], 4294964224  ;;  %v655_v0 = vld [vmem:[#allocation2] sm:$0xff]   ;;  %v656_v1 = vld [vmem:[#allocation2 + $0x8] sm:$0xff]   ;;  %v730_v7 = vmov 0   ;;  %vm342_vm2 = vcmask 1042432  }
  0x14   :  { %600 = vmatprep.subr.bf16.mxu0 %v655_v0  ;;  %v657_v2 = vld [vmem:[#allocation2 + $0x10] sm:$0xff]   ;;  %v658_v3 = vld [vmem:[#allocation2 + $0x18] sm:$0xff]   ;;  %v663_v4 = vld [vmem:[#allocation2 + $0x40] sm:$0xff]   ;;  %vm58_vm0 = vsmask.f32 3328  ;;  %vm343_vm3 = vcmask 1046532  }
  0x15   :  { %601 = vmatpush3.bf16.msra.mxu0 %v655_v0  ;;  %v30_v5 = vld [vmem:[%s855_s0] sm:$0xf]  ;;  %v31_v6 = vld [vmem:[%s855_s0 + $0x4] sm:$0xf]  ;;  %580 = vmatprep.subr.bf16.mxu1 %v663_v4  ;;  %v659_v11 = vld [vmem:[#allocation2 + $0x20] sm:$0xff]   ;;  %s731_s11 = smov [#allocation5]  }
  0x16   :  { %602 = vmatprep.subr.bf16.mxu0 %v656_v1  ;;  %v772_v8 = vmax.bf16 %v730_v7, %v30_v5  ;;  %v774_v9 = vmax.bf16 %v730_v7, %v31_v6  ;;  %581 = vmatpush3.bf16.msra.mxu1 %v663_v4  ;;  %v665_v10 = vld [vmem:[#allocation2 + $0x48] sm:$0xff]   ;;  %v667_v15 = vld [vmem:[#allocation2 + $0x50] sm:$0xff]   ;;  %vm59_vm1 = vsmask.f32 7440  ;;  %v669_v18 = vld [vmem:[#allocation2 + $0x58] sm:$0xff]   ;;  %s505_s12 = sshll.u32 %s731_s11, 4  ;;  %s506_s12 = int_to_ptr.vmem [resolvable:$true] %s505_s12 }
  0x17   :  { %582 = vmatprep.subr.bf16.mxu1 %v665_v10  ;;  %v660_v14 = vld [vmem:[#allocation2 + $0x28] sm:$0xff]   ;;  %v33_v17 = vld [vmem:[%s855_s0 + $0xc] sm:$0xf]  ;;  %v34_v24 = vld [vmem:[%s855_s0 + $0x10] sm:$0xf]  ;;  %s701_s13 = scalar_lea.vmem %s506_s12, 512  ;;  %p706_p9 = scmp.lt.s32.totalorder %s506_s12, %s506_s12 }
  0x18   :  { %v527_v12 = vcombine.low %v772_v8, %v774_v9  ;;  %v62_v13 = vshrl.u32 %v772_v8, 16  ;;  %v65_v16 = vshll.u32 %v772_v8, 16  ;;  %v71_v21 = vshll.u32 %v774_v9, 16  ;;  %v661_v23 = vld [vmem:[#allocation2 + $0x30] sm:$0xff]   ;;  %v671_v27 = vld [vmem:[#allocation2 + $0x60] sm:$0xff]   ;;  %v662_v31 = vld [vmem:[#allocation2 + $0x38] sm:$0xff]   ;;  %p702_p8 = scmp.ne.s32.totalorder %s506_s12, %s701_s13  ;;  %p707_p10 = scmp.lt.s32.totalorder %s701_s13, %s701_s13 }
  0x19   :  { %603 = vmatpush3.bf16.msra.mxu0 %v656_v1  ;;  %v75_v22 = vshrl.u32 %v774_v9, 16  ;;  %v788_v26 = vmax.bf16 %v730_v7, %v33_v17  ;;  %v792_v34 = vmax.bf16 %v730_v7, %v34_v24  ;;  %v673_v35 = vld [vmem:[#allocation2 + $0x68] sm:$0xff]   ;;  %v32_v36 = vld [vmem:[%s855_s0 + $0x8] sm:$0x1]  ;;  %v35_v41 = vld [vmem:[%s855_s0 + $0x14] sm:$0x1] }
  0x1a   :  { %604 = vmatprep.subr.bf16.mxu0 %v657_v2  ;;  %616 = vmatprep.mubr.bf16.mxu0 %v527_v12  ;;  %v64_v19 = vrot.slane %v62_v13, 4  ;;  %v67_v20 = vrot.slane %v65_v16, 5  ;;  %v73_v25 = vrot.slane %v71_v21, 5  ;;  %v38_v38 = vmax.bf16 %v730_v7, %v32_v36  ;;  %vm802_vm4 = vmor %vm58_vm0, %vm59_vm1  ;;  %v664_v52 = vld [vmem:[#allocation2 + $0x80] sm:$0xff]   ;;  %v675_v53 = vld [vmem:[#allocation2 + $0x70] sm:$0xff]   ;;  %p708_p11 = por %p707_p10, %p706_p9 }
  0x1b   :  { %583 = vmatpush3.bf16.msra.mxu1 %v665_v10  ;;  %v77_v29 = vrot.slane %v75_v22, 4  ;;  %v86_v30 = vshrl.u32 %v788_v26, 16  ;;  %v89_v33 = vshll.u32 %v788_v26, 16  ;;  %v806_v43 = vmax.bf16 %v730_v7, %v35_v41  ;;  %vm812_vm5 = vmor %vm342_vm2, %vm343_vm3  ;;  %v666_v4 = vld [vmem:[#allocation2 + $0x88] sm:$0xff]   ;;  %v677_v5 = vld [vmem:[#allocation2 + $0x78] sm:$0xff]  }
  0x1c   :  { %584 = vmatprep.subr.bf16.mxu1 %v667_v15  ;;  %v68_v28 = vor.u32 %v67_v20, %v64_v19  ;;  %v95_v45 = vshll.u32 %v792_v34, 16  ;;  %v99_v46 = vshrl.u32 %v792_v34, 16  ;;  %v81_v47 = vshll.u32 %v38_v38, 16  ;;  %v670_v13 = vld [vmem:[#allocation2 + $0x98] sm:$0xff]   ;;  %v676_v17 = vld [vmem:[#allocation2 + $0xb0] sm:$0xff]   ;;  %p709_p12 = pnand %p708_p11, %p702_p8 }
  0x1d   :  { %605 = vmatpush3.bf16.msra.mxu0 %v657_v2  ;;  %v78_v32 = vor.u32 %v77_v29, %v73_v25  ;;  %v88_v37 = vrot.slane %v86_v30, 4  ;;  %v91_v44 = vrot.slane %v89_v33, 5  ;;  %v537_v49 = vrot.slane %v772_v8, 9  ;;  %v678_v21 = vld [vmem:[#allocation2 + $0xb8] sm:$0xff]   ;;  %v549_v30 = vld [vmem:[%s857_s2] ss:$0 sm:$0xff] }
  0x1e   :  { %606 = vmatprep.subr.bf16.mxu0 %v658_v3  ;;  %v69_v39 = vrot.slane %v68_v28, 4  ;;  %v347_v50 = vrot.slane %v774_v9, 5  ;;  %v350_v51 = vrot.slane %v38_v38, 5  ;;  %v97_v55 = vrot.slane %v95_v45, 5 }
  0x1f   :  { %585 = vmatpush3.bf16.msra.mxu1 %v667_v15  ;;  %v79_v40 = vrot.slane %v78_v32, 4  ;;  %v92_v54 = vor.u32 %v91_v44, %v88_v37  ;;  %v101_v56 = vrot.slane %v99_v46, 4  ;;  %v105_v57 = vshll.u32 %v806_v43, 16  ;;  %v674_v15 = vld [vmem:[#allocation2 + $0xa8] sm:$0xff]  }
  0x20   :  { %586 = vmatprep.subr.bf16.mxu1 %v669_v18  ;;  %v74_v58 = vsel %vm802_vm4, %v69_v39, %v73_v25  ;;  %v83_v59 = vrot.slane %v81_v47, 5  ;;  %v349_v60 = vrot.slane %v347_v50, 4  ;;  %v528_v61 = vcombine.low %v788_v26, %v792_v34 }
  0x21   :  { %607 = vmatpush3.bf16.msra.mxu0 %v658_v3  ;;  %v102_v62 = vor.u32 %v101_v56, %v97_v55  ;;  %v348_v63 = vsel %vm812_vm5, %v537_v49, %v347_v50  ;;  %v93_v1 = vrot.slane %v92_v54, 4  ;;  %v107_v2 = vrot.slane %v105_v57, 5 }
  0x22   :  { %608 = vmatprep.subr.bf16.mxu0 %v659_v11  ;;  %v84_v0 = vsel %vm802_vm4, %v79_v40, %v83_v59  ;;  %v351_v3 = vsel %vm812_vm5, %v349_v60, %v350_v51  ;;  %v354_v16 = vrot.slane %v792_v34, 5  ;;  %v357_v20 = vrot.slane %v806_v43, 5 }
  0x23   :  { %587 = vmatpush3.bf16.msra.mxu1 %v669_v18  ;;  %v517_v6 = vcombine.low %v74_v58, %v84_v0  ;;  %v103_v7 = vrot.slane %v102_v62, 4  ;;  %v539_v8 = vcombine.low %v348_v63, %v351_v3  ;;  %v98_v9 = vsel %vm802_vm4, %v93_v1, %v97_v55 }
  0x24   :  { %588 = vmatprep.subr.bf16.mxu1 %v671_v27  ;;  %v538_v18 = vrot.slane %v788_v26, 9  ;;  %v356_v19 = vrot.slane %v354_v16, 4 }
  0x25   :  { %609 = vmatpush3.bf16.msra.mxu0 %v659_v11  ;;  %596 = vmatprep.mubr.bf16.mxu1 %v517_v6  ;;  %v108_v10 = vsel %vm802_vm4, %v103_v7, %v107_v2  ;;  %v668_v11 = vld [vmem:[#allocation2 + $0x90] sm:$0xff]  }
  0x26   :  { %610 = vmatprep.subr.bf16.mxu0 %v660_v14  ;;  %v518_v12 = vcombine.low %v98_v9, %v108_v10  ;;  %v355_v22 = vsel %vm812_vm5, %v538_v18, %v354_v16 }
  0x27   :  { %589 = vmatpush3.bf16.msra.mxu1 %v671_v27 }
  0x28   :  { %590 = vmatprep.subr.bf16.mxu1 %v673_v35 }
  0x29   :  { %611 = vmatpush3.bf16.msra.mxu0 %v660_v14  ;;  %v672_v14 = vld [vmem:[#allocation2 + $0xa0] sm:$0xff]  }
  0x2a   :  { %612 = vmatprep.subr.bf16.mxu0 %v661_v23 }
  0x2b   :  { %591 = vmatpush3.bf16.msra.mxu1 %v673_v35 }
  0x2c   :  { %592 = vmatprep.subr.bf16.mxu1 %v675_v53 }
  0x2d   :  { %613 = vmatpush3.bf16.msra.mxu0 %v661_v23  ;;  %v358_v23 = vsel %vm812_vm5, %v356_v19, %v357_v20 }
  0x2e   :  { %614 = vmatprep.subr.bf16.mxu0 %v662_v31  ;;  %v540_v24 = vcombine.low %v355_v22, %v358_v23 }
  0x2f   :  { %593 = vmatpush3.bf16.msra.mxu1 %v675_v53 }
  0x30   :  { %594 = vmatprep.subr.bf16.mxu1 %v677_v5 }
  0x31   :  { %615 = vmatpush3.bf16.msra.mxu0 %v662_v31 }
  0x32   :  { %620 = vmatprep.subr.bf16.mxu0 %v664_v52 }
  0x33   :  { %595 = vmatpush3.bf16.msra.mxu1 %v677_v5 }
  0x34   :  { %617 = vmatmul.mubr.bf16.vlgmr.msra.gmra.mrb[0].mxu0 %v528_v61 }
  0x35   :  { %621 = vmatpush3.bf16.msra.mxu0 %v664_v52  ;;  %636 = vmatprep.mubr.bf16.mxu0 %v539_v8 }
  0x36   :  { %622 = vmatprep.subr.bf16.mxu0 %v666_v4  ;;  %597 = vmatmul.mubr.bf16.vlgmr.msra.gmra.mrb[0].mxu1 %v518_v12 }
  0x39   :  { %623 = vmatpush3.bf16.msra.mxu0 %v666_v4 }
  0x3a   :  { %624 = vmatprep.subr.bf16.mxu0 %v668_v11 }
  0x3d   :  { %625 = vmatpush3.bf16.msra.mxu0 %v668_v11 }
  0x3e   :  { %626 = vmatprep.subr.bf16.mxu0 %v670_v13 }
  0x41   :  { %627 = vmatpush3.bf16.msra.mxu0 %v670_v13 }
  0x42   :  { %628 = vmatprep.subr.bf16.mxu0 %v672_v14 }
  0x45   :  { %629 = vmatpush3.bf16.msra.mxu0 %v672_v14 }
  0x46   :  { %630 = vmatprep.subr.bf16.mxu0 %v674_v15 }
  0x49   :  { %631 = vmatpush3.bf16.msra.mxu0 %v674_v15 }
  0x4a   :  { %632 = vmatprep.subr.bf16.mxu0 %v676_v17 }
  0x4d   :  { %633 = vmatpush3.bf16.msra.mxu0 %v676_v17 }
  0x4e   :  { %634 = vmatprep.subr.bf16.mxu0 %v678_v21 }
  0x51   :  { %635 = vmatpush3.bf16.msra.mxu0 %v678_v21 }
  0x54   :  { %637 = vmatmul.mubr.bf16.vlgmr.msra.gmra.mrb[0].mxu0 %v540_v24 }
 0x109   :  { %v598_v25 = vpop.f32.mrb[0].mxu1 }
 0x10a   :  { %v216_v27 = vpop.f32.mrb[1].mxu1 }
 0x10b   :  { %v599_v28 = vpop.f32.mrb[2].mxu1 }
 0x10c   :  { %v219_v26 = vpop.f32.mrb[3].mxu1 }
 0x127   :  { %v638_v29 = vpop.f32.mrb[0].mxu0 }
 0x128   :  { %v640_v31 = vadd.f32 %v638_v29, %v598_v25  ;;  %v466_v32 = vpop.f32.mrb[1].mxu0 }
 0x129   :  { %v641_v33 = vadd.f32 %v466_v32, %v216_v27  ;;  %v639_v34 = vpop.f32.mrb[2].mxu0 }
 0x12a   :  { %v494_v35 = vadd.f32 %v640_v31, %v549_v30  ;;  %v642_v36 = vadd.f32 %v639_v34, %v599_v28  ;;  %v469_v37 = vpop.f32.mrb[3].mxu0 }
 0x12b   :  { %v492_v38 = vadd.f32 %v641_v33, %v549_v30  ;;  %v643_v39 = vadd.f32 %v469_v37, %v219_v26 }
 0x12c   :  { %498 = vst [vmem:[#allocation5 + $0x10] sm:$0xff] %v494_v35  ;;  %v495_v40 = vadd.f32 %v642_v36, %v549_v30 }
 0x12d   :  { %496 = vst [vmem:[#allocation5] sm:$0xff] %v492_v38  ;;  %v493_v41 = vadd.f32 %v643_v39, %v549_v30 }
 0x12e   :  { %499 = vst [vmem:[#allocation5 + $0x18] sm:$0xff] %v495_v40 }
 0x12f   :  { %497 = vst [vmem:[#allocation5 + $0x8] sm:$0xff] %v493_v41 }
 0x130   :  { %712 = shalt.err (!%p709_p12)
}
 0x131   :  { %s713_s15 = scalar_lea.hbm %s858_s3, 512 }
 0x132   :  { %p714_p13 = scmp.ne.s32.totalorder %s858_s3, %s713_s15  ;;  %p717_p0 = scmp.lt.u32.totalorder %s713_s15, %s858_s3 }
 0x134   :  { %p719_p1 = pnand %p717_p0, %p714_p13 }
 0x136   :  { %722 = shalt.err (!%p719_p1)
}
 0x137   :  { %s732_s20 = smov 128   ;;  %s733_s21 = smov 8  }
 0x138   :  { %511 = dma.vmem_to_hbm [thread:$0]  %s506_s12, 512, %s858_s3, [#allocation4], %s732_s20, %s732_s20, %s733_s21  }
 0x139   :  { %725 = dma.done.wait [#allocation4], 512  }
 0x13a   :  { %726 = vsyncadd [#allocation4], 4294966784 }
 0x13b   :  { %515 = vsyncpa [#allocation3], 1 }
 0x13c   :  { %516 = vsyncpa [#allocation4], 1 }

</bundles_post_ra>
